<compile_context>
chip_gen: v7x
topology: tpu7x:2x2x1
jax: 0.10.0
libtpu: 0.0.40
codegen_flags: <defaults>
</compile_context>

<pallas_src>
import functools

import jax
import jax.numpy as jnp
from jax import lax
from jax.experimental import pallas as pl
from jax.experimental.pallas import tpu as pltpu

EPS_PPO = 1e-5
LANES = 128
SUBLANES = 8

# Row order inside the two packed input slabs.
_CONST_RETURNS, _CONST_VALUE_PREDS, _CONST_OLD_ALP = 0, 1, 2   # rollout-constant
_MB_VALUES, _MB_ALP, _MB_ENTROPY = 0, 1, 2                     # per-minibatch


# --------------------------------------------------------------------------
# Fused kernel.
#   const_ref : (3, R, 128) f32  [returns, value_preds, old_action_log_probs]
#   mb_ref    : (3, R, 128) f32  [values, action_log_probs, dist_entropy]
#   adv_ref   : (R, 128)    f32  normalized advantages (dense slab)
#   sums_ref  : (3,)        f32  SMEM = [sum(min_surr), sum(vloss), sum(entropy)]
# --------------------------------------------------------------------------
def _ppo_fused_kernel(
    const_ref,
    mb_ref,
    adv_ref,
    sums_ref,
    *,
    n,
    r,
    clip_param,
    use_clipped_value_loss,
    use_normalized_advantage,
):
    n_pad = r * LANES

    returns = const_ref[_CONST_RETURNS]        # (R, 128)
    value_preds = const_ref[_CONST_VALUE_PREDS]
    old_alp = const_ref[_CONST_OLD_ALP]
    values = mb_ref[_MB_VALUES]
    alp = mb_ref[_MB_ALP]
    entropy = mb_ref[_MB_ENTROPY]

    # Padded tail columns of every input are zero -> adv_raw / vloss / entropy
    # are already exactly zero there.
    adv_raw = returns - value_preds

    # EUP work pushed early; it has no dependence on any reduction result, so
    # the scheduler can overlap it with the XLU reduction passes below.
    ratio = jnp.exp(alp - old_alp)
    ratio_clipped = jnp.clip(ratio, 1.0 - clip_param, 1.0 + clip_param)

    # --- (clipped) value-loss per-element terms (mean-independent) ---
    if use_clipped_value_loss:
        vpc = value_preds + jnp.clip(values - value_preds, -clip_param, clip_param)
        d0 = values - returns
        d1 = vpc - returns
        vloss = jnp.maximum(d0 * d0, d1 * d1)
    else:
        d = returns - values
        vloss = d * d

    # --- pass A: one merged lane-reduce over the mean-independent sums ---
    stacked = jnp.concatenate([adv_raw, vloss, entropy], axis=0)   # (3R, 128)
    lane_sums = jnp.sum(stacked, axis=-1, keepdims=True)           # (3R, 1)
    s_adv = jnp.sum(lane_sums[0:r, :], axis=0, keepdims=True)          # (1, 1)
    s_vloss = jnp.sum(lane_sums[r:2 * r, :], axis=0, keepdims=True)    # (1, 1)
    s_ent = jnp.sum(lane_sums[2 * r:3 * r, :], axis=0, keepdims=True)  # (1, 1)

    if use_normalized_advantage:
        mean = s_adv * (1.0 / float(n))                  # (1, 1)
        centered = adv_raw - mean                        # broadcast over (R, 128)
        if n_pad != n:
            # Zero the padded tail so it contributes neither to the variance
            # nor (via adv == 0) to the surrogate sum.  One where() pass, only
            # emitted when padding exists and only in the normalized path.
            row = lax.broadcasted_iota(jnp.int32, (r, LANES), 0)
            col = lax.broadcasted_iota(jnp.int32, (r, LANES), 1)
            centered = jnp.where(row * LANES + col < n, centered, 0.0)
        # --- pass B: two-pass (numerically robust) unbiased variance ---
        cen2_lane = jnp.sum(centered * centered, axis=-1, keepdims=True)  # (R, 1)
        var = jnp.sum(cen2_lane, axis=0, keepdims=True) * (1.0 / float(n - 1))
        inv_scale = pl.reciprocal(jnp.sqrt(var) + EPS_PPO)                # (1, 1)
        adv = centered * inv_scale                        # padded tail stays 0
    else:
        adv = adv_raw

    adv_ref[...] = adv                                    # dense full-vreg store

    # --- clipped surrogate (actor) terms + pass C ---
    surr1 = ratio * adv
    surr2 = ratio_clipped * adv
    min_surr = jnp.minimum(surr1, surr2)
    surr_lane = jnp.sum(min_surr, axis=-1, keepdims=True)            # (R, 1)
    s_surr = jnp.sum(surr_lane, axis=0, keepdims=True)               # (1, 1)

    # Epilogue: raw sums only; coefficient math happens on the host.
    sums_ref[0] = s_surr[0, 0]
    sums_ref[1] = s_vloss[0, 0]
    sums_ref[2] = s_ent[0, 0]


# --------------------------------------------------------------------------
# Host-side helpers.
# --------------------------------------------------------------------------
def _padded_rows(n):
    r = int(pl.cdiv(n, LANES))
    return int(pl.cdiv(r, SUBLANES)) * SUBLANES


def pack_rows(arrays, n):
    """Pack a list of same-size arrays into one dense (len, R, 128) f32 slab.

    Call once per rollout for the rollout-constant tensors (returns,
    value_preds, old_action_log_probs) and once per minibatch for the
    policy-dependent tensors (values, action_log_probs, entropy).
    """
    r = _padded_rows(n)
    n_pad = r * LANES
    rows = []
    for a in arrays:
        a = jnp.asarray(a, jnp.float32).reshape(-1)
        if a.shape[0] != n_pad:
            a = jnp.pad(a, (0, n_pad - a.shape[0]))
        rows.append(a.reshape(r, LANES))
    return jnp.stack(rows, axis=0)


def ppo_update_step(
    rollout_pack,
    minibatch_pack,
    n,
    *,
    clip_param=0.2,
    value_loss_coef=0.5,
    entropy_coef=0.01,
    use_clipped_value_loss=True,
    use_normalized_advantage=True,
):
    """Fused get_advantages + PPO minibatch loss; one pallas_call.

    Args:
      rollout_pack:   (3, R, 128) from pack_rows([returns, value_preds,
                      old_action_log_probs], n) -- build once per rollout.
      minibatch_pack: (3, R, 128) from pack_rows([values, action_log_probs,
                      dist_entropy], n) -- rebuilt per minibatch.
      n:              number of valid transitions.

    Returns:
      (adv_slab (R, 128), losses (4,) = [value_loss, action_loss,
       dist_entropy, total_loss]).
    """
    n = int(n)
    if use_normalized_advantage and n < 2:
        raise ValueError("advantage normalization (ddof=1) requires >= 2 elements")
    r = int(rollout_pack.shape[1])
    assert rollout_pack.shape == (3, r, LANES) == minibatch_pack.shape

    kern = functools.partial(
        _ppo_fused_kernel,
        n=n,
        r=r,
        clip_param=float(clip_param),
        use_clipped_value_loss=use_clipped_value_loss,
        use_normalized_advantage=use_normalized_advantage,
    )

    # Whole-problem-resident design: raise the scoped VMEM limit only when the
    # rough resident footprint (inputs + output + intermediates) needs it.
    resident_bytes = 16 * r * LANES * 4
    compiler_params = None
    if resident_bytes > (24 << 20):
        compiler_params = pltpu.CompilerParams(
            vmem_limit_bytes=min(resident_bytes + (8 << 20), 100 << 20)
        )

    adv_slab, sums = pl.pallas_call(
        kern,
        out_shape=(
            jax.ShapeDtypeStruct((r, LANES), jnp.float32),
            jax.ShapeDtypeStruct((3,), jnp.float32),
        ),
        in_specs=[
            pl.BlockSpec(memory_space=pltpu.MemorySpace.VMEM),
            pl.BlockSpec(memory_space=pltpu.MemorySpace.VMEM),
        ],
        out_specs=(
            pl.BlockSpec(memory_space=pltpu.MemorySpace.VMEM),
            pl.BlockSpec(memory_space=pltpu.MemorySpace.SMEM),
        ),
        compiler_params=compiler_params,
    )(rollout_pack, minibatch_pack)

    inv_n = 1.0 / float(n)
    action_loss = -sums[0] * inv_n
    value_loss = 0.5 * sums[1] * inv_n
    dist_entropy = sums[2] * inv_n
    total_loss = (
        value_loss * value_loss_coef + action_loss - dist_entropy * entropy_coef
    )
    losses = jnp.stack([value_loss, action_loss, dist_entropy, total_loss])
    return adv_slab, losses


def unpack_advantages(adv_slab, n, shape):
    return adv_slab.reshape(-1)[:n].reshape(shape)


# --------------------------------------------------------------------------
# Pure-JAX references for correctness checking.
# --------------------------------------------------------------------------
def _ref_advantages(returns, value_preds, use_norm=True):
    adv = returns - value_preds
    if not use_norm:
        return adv
    return (adv - adv.mean()) / (adv.std(ddof=1) + EPS_PPO)


def _ref_loss(values, alp, old_alp, adv, vpreds, rets, ent, c, vc, ec):
    ratio = jnp.exp(alp - old_alp)
    surr1 = ratio * adv
    surr2 = jnp.clip(ratio, 1.0 - c, 1.0 + c) * adv
    action_loss = -jnp.minimum(surr1, surr2).mean()
    vpc = vpreds + jnp.clip(values - vpreds, -c, c)
    value_loss = 0.5 * jnp.maximum((values - rets) ** 2, (vpc - rets) ** 2).mean()
    de = ent.mean()
    total = value_loss * vc + action_loss - de * ec
    return jnp.stack([value_loss, action_loss, de, total])


if __name__ == "__main__":
    T, E = 8, 16  # num_steps, num_envs -> 128 transitions
    key = jax.random.PRNGKey(0)
    ks = jax.random.split(key, 6)

    returns = jax.random.normal(ks[0], (T, E), jnp.float32)
    value_preds = jax.random.normal(ks[1], (T, E), jnp.float32)
    values = value_preds + 0.1 * jax.random.normal(ks[2], (T, E), jnp.float32)
    old_action_log_probs = -jnp.abs(jax.random.normal(ks[3], (T, E), jnp.float32))
    action_log_probs = old_action_log_probs + 0.05 * jax.random.normal(
        ks[4], (T, E), jnp.float32
    )
    dist_entropy = jnp.abs(jax.random.normal(ks[5], (T, E), jnp.float32))

    clip_param, value_loss_coef, entropy_coef = 0.2, 0.5, 0.01
    n = T * E

    # Packed ONCE per rollout (constant across all ppo_epoch x num_mini_batch
    # calls of PPO.update()).
    rollout_pack = pack_rows([returns, value_preds, old_action_log_probs], n)
    # Packed per minibatch (changes whenever the policy is re-evaluated).
    minibatch_pack = pack_rows([values, action_log_probs, dist_entropy], n)

    adv_slab, losses = ppo_update_step(
        rollout_pack,
        minibatch_pack,
        n,
        clip_param=clip_param,
        value_loss_coef=value_loss_coef,
        entropy_coef=entropy_coef,
        use_clipped_value_loss=True,
        use_normalized_advantage=True,
    )
    adv_slab = jax.block_until_ready(adv_slab)
    losses = jax.block_until_ready(losses)
    advantages = unpack_advantages(adv_slab, n, (T, E))

    # --- reference path ---
    adv_ref = _ref_advantages(returns, value_preds, True)
    losses_ref = _ref_loss(
        values,
        action_log_probs,
        old_action_log_probs,
        adv_ref,
        value_preds,
        returns,
        dist_entropy,
        clip_param,
        value_loss_coef,
        entropy_coef,
    )

    assert jnp.allclose(advantages, adv_ref, atol=1e-5, rtol=1e-5), "advantages mismatch"
    assert jnp.allclose(losses, losses_ref, atol=1e-5, rtol=1e-5), "loss mismatch"

    print("KERNEL_OK")
</pallas_src>

<mosaic_0001>
module attributes {stable_mosaic.version = 11 : i64} {
  func.func @_ppo_fused_kernel(%arg0: memref<3x8x128xf32, #tpu.memory_space<vmem>>, %arg1: memref<3x8x128xf32, #tpu.memory_space<vmem>>, %arg2: memref<8x128xf32, #tpu.memory_space<vmem>>, %arg3: memref<3xf32, #tpu.memory_space<smem>>) attributes {dimension_semantics = [], scalar_prefetch = 0 : i64, scratch_operands = 0 : i64, tpu.core_type = #tpu.core_type<tc>} {
    %c0 = arith.constant 0 : index
    %c0_0 = arith.constant 0 : index
    %c0_1 = arith.constant 0 : index
    %0 = vector.load %arg0[%c0, %c0_0, %c0_1] : memref<3x8x128xf32, #tpu.memory_space<vmem>>, vector<1x8x128xf32>
    %1 = vector.shape_cast %0 : vector<1x8x128xf32> to vector<8x128xf32>
    %c1 = arith.constant 1 : index
    %c0_2 = arith.constant 0 : index
    %c0_3 = arith.constant 0 : index
    %2 = vector.load %arg0[%c1, %c0_2, %c0_3] : memref<3x8x128xf32, #tpu.memory_space<vmem>>, vector<1x8x128xf32>
    %3 = vector.shape_cast %2 : vector<1x8x128xf32> to vector<8x128xf32>
    %c2 = arith.constant 2 : index
    %c0_4 = arith.constant 0 : index
    %c0_5 = arith.constant 0 : index
    %4 = vector.load %arg0[%c2, %c0_4, %c0_5] : memref<3x8x128xf32, #tpu.memory_space<vmem>>, vector<1x8x128xf32>
    %5 = vector.shape_cast %4 : vector<1x8x128xf32> to vector<8x128xf32>
    %c0_6 = arith.constant 0 : index
    %c0_7 = arith.constant 0 : index
    %c0_8 = arith.constant 0 : index
    %6 = vector.load %arg1[%c0_6, %c0_7, %c0_8] : memref<3x8x128xf32, #tpu.memory_space<vmem>>, vector<1x8x128xf32>
    %7 = vector.shape_cast %6 : vector<1x8x128xf32> to vector<8x128xf32>
    %c1_9 = arith.constant 1 : index
    %c0_10 = arith.constant 0 : index
    %c0_11 = arith.constant 0 : index
    %8 = vector.load %arg1[%c1_9, %c0_10, %c0_11] : memref<3x8x128xf32, #tpu.memory_space<vmem>>, vector<1x8x128xf32>
    %9 = vector.shape_cast %8 : vector<1x8x128xf32> to vector<8x128xf32>
    %c2_12 = arith.constant 2 : index
    %c0_13 = arith.constant 0 : index
    %c0_14 = arith.constant 0 : index
    %10 = vector.load %arg1[%c2_12, %c0_13, %c0_14] : memref<3x8x128xf32, #tpu.memory_space<vmem>>, vector<1x8x128xf32>
    %11 = vector.shape_cast %10 : vector<1x8x128xf32> to vector<8x128xf32>
    %12 = arith.subf %1, %3 : vector<8x128xf32>
    %13 = arith.subf %9, %5 : vector<8x128xf32>
    %14 = math.exp %13 : vector<8x128xf32>
    %cst = arith.constant 8.000000e-01 : f32
    %cst_15 = arith.constant 1.200000e+00 : f32
    %15 = vector.broadcast %cst : f32 to vector<8x128xf32>
    %16 = arith.maximumf %15, %14 : vector<8x128xf32>
    %17 = vector.broadcast %cst_15 : f32 to vector<8x128xf32>
    %18 = arith.minimumf %17, %16 : vector<8x128xf32>
    %19 = arith.subf %7, %3 : vector<8x128xf32>
    %cst_16 = arith.constant -2.000000e-01 : f32
    %cst_17 = arith.constant 2.000000e-01 : f32
    %20 = vector.broadcast %cst_16 : f32 to vector<8x128xf32>
    %21 = arith.maximumf %20, %19 : vector<8x128xf32>
    %22 = vector.broadcast %cst_17 : f32 to vector<8x128xf32>
    %23 = arith.minimumf %22, %21 : vector<8x128xf32>
    %24 = arith.addf %3, %23 : vector<8x128xf32>
    %25 = arith.subf %7, %1 : vector<8x128xf32>
    %26 = arith.subf %24, %1 : vector<8x128xf32>
    %27 = arith.mulf %25, %25 : vector<8x128xf32>
    %28 = arith.mulf %26, %26 : vector<8x128xf32>
    %29 = arith.maximumf %27, %28 : vector<8x128xf32>
    %30 = tpu.concatenate %12, %29, %11 in 0 : vector<8x128xf32>, vector<8x128xf32>, vector<8x128xf32> -> vector<24x128xf32>
    %cst_18 = arith.constant dense<0.000000e+00> : vector<24xf32>
    %31 = vector.multi_reduction <add>, %30, %cst_18 [1] : vector<24x128xf32> to vector<24xf32>
    %32 = vector.shape_cast %31 : vector<24xf32> to vector<24x1xf32>
    %33 = vector.extract_strided_slice %32 {offsets = [0, 0], sizes = [8, 1], strides = [1, 1]} : vector<24x1xf32> to vector<8x1xf32>
    %cst_19 = arith.constant dense<0.000000e+00> : vector<1xf32>
    %34 = vector.multi_reduction <add>, %33, %cst_19 [0] : vector<8x1xf32> to vector<1xf32>
    %35 = vector.shape_cast %34 : vector<1xf32> to vector<1x1xf32>
    %36 = vector.extract_strided_slice %32 {offsets = [8, 0], sizes = [8, 1], strides = [1, 1]} : vector<24x1xf32> to vector<8x1xf32>
    %cst_20 = arith.constant dense<0.000000e+00> : vector<1xf32>
    %37 = vector.multi_reduction <add>, %36, %cst_20 [0] : vector<8x1xf32> to vector<1xf32>
    %38 = vector.shape_cast %37 : vector<1xf32> to vector<1x1xf32>
    %39 = vector.extract_strided_slice %32 {offsets = [16, 0], sizes = [8, 1], strides = [1, 1]} : vector<24x1xf32> to vector<8x1xf32>
    %cst_21 = arith.constant dense<0.000000e+00> : vector<1xf32>
    %40 = vector.multi_reduction <add>, %39, %cst_21 [0] : vector<8x1xf32> to vector<1xf32>
    %41 = vector.shape_cast %40 : vector<1xf32> to vector<1x1xf32>
    %cst_22 = arith.constant 7.812500e-03 : f32
    %42 = vector.broadcast %cst_22 : f32 to vector<1x1xf32>
    %43 = arith.mulf %35, %42 : vector<1x1xf32>
    %44 = vector.broadcast %43 : vector<1x1xf32> to vector<8x128xf32>
    %45 = arith.subf %12, %44 : vector<8x128xf32>
    %46 = tpu.iota {dimensions = array<i32: 0>} : vector<8x128xi32>
    %47 = tpu.iota {dimensions = array<i32: 1>} : vector<8x128xi32>
    %c128_i32 = arith.constant 128 : i32
    %48 = vector.broadcast %c128_i32 : i32 to vector<8x128xi32>
    %49 = arith.muli %46, %48 : vector<8x128xi32>
    %50 = arith.addi %49, %47 : vector<8x128xi32>
    %c128_i32_23 = arith.constant 128 : i32
    %51 = vector.broadcast %c128_i32_23 : i32 to vector<8x128xi32>
    %52 = arith.cmpi slt, %50, %51 : vector<8x128xi32>
    %cst_24 = arith.constant 0.000000e+00 : f32
    %53 = vector.broadcast %cst_24 : f32 to vector<8x128xf32>
    %54 = arith.select %52, %45, %53 : vector<8x128xi1>, vector<8x128xf32>
    %55 = arith.mulf %54, %54 : vector<8x128xf32>
    %cst_25 = arith.constant dense<0.000000e+00> : vector<8xf32>
    %56 = vector.multi_reduction <add>, %55, %cst_25 [1] : vector<8x128xf32> to vector<8xf32>
    %57 = vector.shape_cast %56 : vector<8xf32> to vector<8x1xf32>
    %cst_26 = arith.constant dense<0.000000e+00> : vector<1xf32>
    %58 = vector.multi_reduction <add>, %57, %cst_26 [0] : vector<8x1xf32> to vector<1xf32>
    %59 = vector.shape_cast %58 : vector<1xf32> to vector<1x1xf32>
    %cst_27 = arith.constant 0.00787401571 : f32
    %60 = vector.broadcast %cst_27 : f32 to vector<1x1xf32>
    %61 = arith.mulf %59, %60 : vector<1x1xf32>
    %62 = math.sqrt %61 : vector<1x1xf32>
    %cst_28 = arith.constant 9.99999974E-6 : f32
    %63 = vector.broadcast %cst_28 : f32 to vector<1x1xf32>
    %64 = arith.addf %62, %63 : vector<1x1xf32>
    %65 = tpu.reciprocal %64 : vector<1x1xf32> -> vector<1x1xf32>
    %66 = vector.broadcast %65 : vector<1x1xf32> to vector<8x128xf32>
    %67 = arith.mulf %54, %66 : vector<8x128xf32>
    %c0_29 = arith.constant 0 : index
    %c0_30 = arith.constant 0 : index
    %68 = vector.load %arg2[%c0_29, %c0_30] : memref<8x128xf32, #tpu.memory_space<vmem>>, vector<8x128xf32>
    tpu.vector_store %arg2[%c0_29, %c0_30], %67 {strides = array<i32>} : memref<8x128xf32, #tpu.memory_space<vmem>>, vector<8x128xf32>,
    %69 = arith.mulf %14, %67 : vector<8x128xf32>
    %70 = arith.mulf %18, %67 : vector<8x128xf32>
    %71 = arith.minimumf %69, %70 : vector<8x128xf32>
    %cst_31 = arith.constant dense<0.000000e+00> : vector<8xf32>
    %72 = vector.multi_reduction <add>, %71, %cst_31 [1] : vector<8x128xf32> to vector<8xf32>
    %73 = vector.shape_cast %72 : vector<8xf32> to vector<8x1xf32>
    %cst_32 = arith.constant dense<0.000000e+00> : vector<1xf32>
    %74 = vector.multi_reduction <add>, %73, %cst_32 [0] : vector<8x1xf32> to vector<1xf32>
    %75 = vector.shape_cast %74 : vector<1xf32> to vector<1x1xf32>
    %76 = vector.extract %75[0, 0] : f32 from vector<1x1xf32>
    %c0_33 = arith.constant 0 : index
    %77 = memref.load %arg3[%c0_33] : memref<3xf32, #tpu.memory_space<smem>>
    memref.store %76, %arg3[%c0_33] : memref<3xf32, #tpu.memory_space<smem>>
    %78 = vector.extract %38[0, 0] : f32 from vector<1x1xf32>
    %c1_34 = arith.constant 1 : index
    %79 = memref.load %arg3[%c1_34] : memref<3xf32, #tpu.memory_space<smem>>
    memref.store %78, %arg3[%c1_34] : memref<3xf32, #tpu.memory_space<smem>>
    %80 = vector.extract %41[0, 0] : f32 from vector<1x1xf32>
    %c2_35 = arith.constant 2 : index
    %81 = memref.load %arg3[%c2_35] : memref<3xf32, #tpu.memory_space<smem>>
    memref.store %80, %arg3[%c2_35] : memref<3xf32, #tpu.memory_space<smem>>
    return
  }
}

</mosaic_0001>

<bundles_post_ra>
// kernel: tpu_custom_call.1
= control target key start
LH: loop header
LB: loop body
LE: loop exit
PB: predicated region body
PF: predicated region fallthrough
CT: control target
= control target key end

     0   :  { %9 = vsyncpa [#allocation3], 0  ;;  %s349_s0 = inlined_call_operand.hbm [shape: f32[3,8,128], index: 0, kind: input, shape index: {}]   ;;  %s350_s1 = inlined_call_operand.hbm [shape: f32[3,8,128], index: 1, kind: input, shape index: {}]   ;;  %s351_s2 = inlined_call_operand.hbm [shape: f32[8,128], index: 2, kind: output, shape index: {0}]   ;;  %s352_s3 = inlined_call_operand.hbm [shape: f32[3], index: 3, kind: output, shape index: {1}]  }
   0x1   :  { %10 = vsyncpa [#allocation7], 0 }
   0x2   :  { %11 = vsyncpa [#allocation4], 0 }
   0x3   :  { %12 = vsyncpa [#allocation5], 0  ;;  %s275_s12 = smov [#allocation2]   ;;  %s191_s16 = scalar_lea.hbm %s349_s0, 384 }
   0x4   :  { %s18_s13 = sshll.u32 %s275_s12, 4  ;;  %p192_p0 = scmp.ne.s32.totalorder %s349_s0, %s191_s16  ;;  %s19_s13 = int_to_ptr.vmem [resolvable:$true] %s18_s13 }
   0x5   :  { %p195_p1 = scmp.lt.u32.totalorder %s191_s16, %s349_s0 }
   0x7   :  { %p197_p2 = pnand %p195_p1, %p192_p0 }
   0x9   :  { %200 = shalt.err (!%p197_p2)
}
   0xa   :  { %s201_s21 = scalar_lea.vmem %s19_s13, 384  ;;  %p206_p4 = scmp.lt.s32.totalorder %s19_s13, %s19_s13 }
   0xb   :  { %p202_p3 = scmp.ne.s32.totalorder %s19_s13, %s201_s21  ;;  %p207_p5 = scmp.lt.s32.totalorder %s201_s21, %s201_s21 }
   0xd   :  { %p208_p6 = por %p207_p5, %p206_p4 }
   0xf   :  { %p209_p7 = pnand %p208_p6, %p202_p3 }
  0x11   :  { %212 = shalt.err (!%p209_p7)
}
  0x12   :  { %s276_s22 = smov 128   ;;  %s277_s23 = smov 8  }
  0x13   :  { %24 = dma.hbm_to_vmem [thread:$0]  %s349_s0, 384, %s19_s13, [#allocation3], %s276_s22, %s276_s22, %s277_s23  }
  0x14   :  { %s278_s26 = smov [#allocation6]   ;;  %s213_s30 = scalar_lea.hbm %s350_s1, 384 }
  0x15   :  { %s30_s27 = sshll.u32 %s278_s26, 4  ;;  %p214_p8 = scmp.ne.s32.totalorder %s350_s1, %s213_s30  ;;  %s31_s27 = int_to_ptr.vmem [resolvable:$true] %s30_s27 }
  0x16   :  { %p217_p9 = scmp.lt.u32.totalorder %s213_s30, %s350_s1 }
  0x18   :  { %p219_p10 = pnand %p217_p9, %p214_p8 }
  0x1a   :  { %222 = shalt.err (!%p219_p10)
}
  0x1b   :  { %s223_s8 = scalar_lea.vmem %s31_s27, 384  ;;  %p228_p12 = scmp.lt.s32.totalorder %s31_s27, %s31_s27 }
  0x1c   :  { %p224_p11 = scmp.ne.s32.totalorder %s31_s27, %s223_s8  ;;  %p229_p13 = scmp.lt.s32.totalorder %s223_s8, %s223_s8 }
  0x1e   :  { %p230_p0 = por %p229_p13, %p228_p12 }
  0x20   :  { %p231_p1 = pnand %p230_p0, %p224_p11 }
  0x22   :  { %234 = shalt.err (!%p231_p1)
}
  0x23   :  { %36 = dma.hbm_to_vmem [thread:$0]  %s350_s1, 384, %s31_s27, [#allocation7], %s276_s22, %s276_s22, %s277_s23  }
  0x24   :  { %267 = dma.done.wait [#allocation3], 384  }
  0x25   :  { %268 = vsyncadd [#allocation3], 4294966912 }
  0x26   :  { %269 = dma.done.wait [#allocation7], 384  }
  0x27   :  { %270 = vsyncadd [#allocation7], 4294966912  ;;  %v43_v0 = vld [vmem:[#allocation2] sm:$0xff]  ;;  %v45_v1 = vld [vmem:[#allocation2 + $0x8] sm:$0xff]  ;;  %v94_v3 = vlaneseq  ;;  %s279_s1 = smov [#allocation8]  }
  0x28   :  { %v53_v2 = vsub.f32 %v43_v0, %v45_v1  ;;  %v48_v19 = vld [vmem:[#allocation6] sm:$0xff]  ;;  %v52_v28 = vld [vmem:[#allocation6 + $0x10] sm:$0xff]  ;;  %v47_v37 = vld [vmem:[#allocation2 + $0x10] sm:$0xff]  ;;  %s149_s10 = sshll.u32 %s279_s1, 4  ;;  %s150_s10 = int_to_ptr.vmem [resolvable:$true] %s149_s10 }
  0x29   :  { %v95_v6 = vshrl.u32 %v94_v3, 7  ;;  %v97_v9 = vand.u32 127, %v94_v3  ;;  %v59_v20 = vsub.f32 %v48_v19, %v45_v1  ;;  %v63_v22 = vsub.f32 %v48_v19, %v43_v0  ;;  %v50_v38 = vld [vmem:[#allocation6 + $0x8] sm:$0xff]  ;;  %s235_s11 = scalar_lea.vmem %s150_s10, 128  ;;  %p240_p3 = scmp.lt.s32.totalorder %s150_s10, %s150_s10 }
  0x2a   :  { %68 = vadd.xlane.f32.xlu0 %v53_v2  ;;  %v54_v39 = vsub.f32 %v50_v38, %v47_v37  ;;  %p236_p2 = scmp.ne.s32.totalorder %s150_s10, %s235_s11  ;;  %p241_p4 = scmp.lt.s32.totalorder %s235_s11, %s235_s11 }
  0x2b   :  { %v98_v10 = vmul.u32 128, %v95_v6  ;;  %v172_v21 = vclamps-f32 %v59_v20, 0.2  ;;  %v65_v25 = vmul.f32 %v63_v22, %v63_v22 }
  0x2c   :  { %v55_v40 = vmul.f32 1.442695, %v54_v39  ;;  %p242_p5 = por %p241_p4, %p240_p3 }
  0x2d   :  { %v99_v13 = vadd.s32 %v98_v10, %v97_v9  ;;  %v62_v23 = vadd.f32 %v172_v21, %v45_v1 }
  0x2e   :  { %p243_p6 = pnand %p242_p5, %p236_p2 }
  0x2f   :  { %vm100_vm0 = vcmp.lt.s32.totalorder %v99_v13, 128  ;;  %v64_v24 = vsub.f32 %v62_v23, %v43_v0 }
  0x31   :  { %v66_v26 = vmul.f32 %v64_v24, %v64_v24 }
  0x33   :  { %v67_v27 = vmax.f32 %v65_v25, %v66_v26 }
  0x35   :  { %70 = vadd.xlane.f32.xlu1 %v67_v27 }
  0x39   :  { %72 = vadd.xlane.f32.xlu1 %v52_v28 }
  0xb7   :  { %v69_v4 = vpop.xlane.xlu0 %68 }
  0xb8   :  { %v74_v5 = vrot.slane %v69_v4, 4 }
  0xba   :  { %v75_v7 = vadd.f32 %v74_v5, %v69_v4 }
  0xbc   :  { %v76_v8 = vrot.slane %v75_v7, 2 }
  0xbe   :  { %v77_v11 = vadd.f32 %v76_v8, %v75_v7 }
  0xc0   :  { %v78_v12 = vrot.slane %v77_v11, 1 }
  0xc2   :  { %v79_v14 = vadd.f32 %v78_v12, %v77_v11 }
  0xc4   :  { %v92_v15 = vmul.f32 0.0078125, %v79_v14 }
  0xc6   :  { %v93_v16 = vsub.f32 %v53_v2, %v92_v15 }
  0xc8   :  { %v101_v17 = vsel %vm100_vm0, %v93_v16, 0.0 }
  0xc9   :  { %v102_v18 = vmul.f32 %v101_v17, %v101_v17 }
  0xcb   :  { %103 = vadd.xlane.f32.xlu0 %v102_v18 }
 0x158   :  { %v104_v29 = vpop.xlane.xlu0 %103 }
 0x159   :  { %v105_v30 = vrot.slane %v104_v29, 4 }
 0x15b   :  { %v106_v31 = vadd.f32 %v105_v30, %v104_v29 }
 0x15d   :  { %v107_v32 = vrot.slane %v106_v31, 2 }
 0x15f   :  { %v108_v33 = vadd.f32 %v107_v32, %v106_v31 }
 0x161   :  { %v109_v34 = vrot.slane %v108_v33, 1 }
 0x163   :  { %v110_v35 = vadd.f32 %v109_v34, %v108_v33 }
 0x165   :  { %v111_v36 = vmul.f32 0.007874016, %v110_v35 }
 0x167   :  { %185 = vrsqrt.f32 %v111_v36  ;;  %vm114_vm1 = vcmp.eq.f32.partialorder %v111_v36, inf  ;;  %v117_v43 = vand.u32 2147483648, %v111_v36  ;;  %vm116_vm2 = vcmp.eq.f32.partialorder %v111_v36, 0.0 }
 0x168   :  { %187 = vpow2.f32 %v55_v40 }
 0x171   :  { %v186_v41 = vpop.eup %185 }
 0x172   :  { %v113_v42 = vmul.f32 %v186_v41, %v111_v36  ;;  %v188_v47 = vpop.eup %187 }
 0x173   :  { %v57_v48 = vmax.f32 %v188_v47, 0.8 }
 0x174   :  { %v115_v44 = vsel %vm114_vm1, %v111_v36, %v113_v42 }
 0x175   :  { %v118_v45 = vsel %vm116_vm2, %v117_v43, %v115_v44  ;;  %v58_v49 = vmin.f32 %v57_v48, 1.2 }
 0x176   :  { %v119_v46 = vadd.f32 1e-05, %v118_v45 }
 0x178   :  { %189 = vrcp.f32 %v119_v46 }
 0x182   :  { %v190_v50 = vpop.eup %189 }
 0x183   :  { %v121_v51 = vmul.f32 %v190_v50, %v101_v17 }
 0x185   :  { %v123_v52 = vmul.f32 %v188_v47, %v121_v51  ;;  %v124_v53 = vmul.f32 %v121_v51, %v58_v49  ;;  %122 = vst [vmem:[#allocation8] sm:$0xff] %v121_v51 }
 0x187   :  { %v125_v54 = vmin.f32 %v123_v52, %v124_v53 }
 0x189   :  { %126 = vadd.xlane.f32.xlu0 %v125_v54 }
 0x18a   :  { %246 = shalt.err (!%p243_p6)
}
 0x18b   :  { %s247_s14 = scalar_lea.hbm %s351_s2, 128 }
 0x18c   :  { %p248_p7 = scmp.ne.s32.totalorder %s351_s2, %s247_s14  ;;  %p251_p8 = scmp.lt.u32.totalorder %s247_s14, %s351_s2 }
 0x18e   :  { %p253_p9 = pnand %p251_p8, %p248_p7 }
 0x190   :  { %256 = shalt.err (!%p253_p9)
}
 0x191   :  { %152 = dma.vmem_to_hbm [thread:$0]  %s150_s10, 128, %s351_s2, [#allocation4]   ;;  %v71_v55 = vpop.xlane.xlu1 %70 }
 0x192   :  { %v80_v57 = vrot.slane %v71_v55, 4  ;;  %s257_s25 = scalar_lea.hbm %s352_s3, 16 }
 0x193   :  { %p258_p10 = scmp.ne.s32.totalorder %s352_s3, %s257_s25  ;;  %p261_p11 = scmp.lt.u32.totalorder %s257_s25, %s352_s3 }
 0x194   :  { %v81_v59 = vadd.f32 %v80_v57, %v71_v55 }
 0x195   :  { %v73_v56 = vpop.xlane.xlu1 %72  ;;  %p263_p12 = pnand %p261_p11, %p258_p10 }
 0x196   :  { %v86_v58 = vrot.slane %v73_v56, 4  ;;  %v82_v61 = vrot.slane %v81_v59, 2 }
 0x198   :  { %v87_v60 = vadd.f32 %v86_v58, %v73_v56  ;;  %v83_v2 = vadd.f32 %v82_v61, %v81_v59 }
 0x19a   :  { %v88_v63 = vrot.slane %v87_v60, 2  ;;  %v84_v6 = vrot.slane %v83_v2, 1 }
 0x19c   :  { %v89_v3 = vadd.f32 %v88_v63, %v87_v60  ;;  %v85_v10 = vadd.f32 %v84_v6, %v83_v2 }
 0x19e   :  { %v90_v8 = vrot.slane %v89_v3, 1 }
 0x1a0   :  { %v91_v11 = vadd.f32 %v90_v8, %v89_v3 }
 0x216   :  { %v127_v62 = vpop.xlane.xlu0 %126 }
 0x217   :  { %v128_v0 = vrot.slane %v127_v62, 4 }
 0x219   :  { %v129_v1 = vadd.f32 %v128_v0, %v127_v62 }
 0x21b   :  { %v130_v4 = vrot.slane %v129_v1, 2 }
 0x21d   :  { %v131_v5 = vadd.f32 %v130_v4, %v129_v1 }
 0x21f   :  { %v132_v7 = vrot.slane %v131_v5, 1 }
 0x221   :  { %v133_v9 = vadd.f32 %v132_v7, %v131_v5 }
 0x223   :  { %173 = vpush %v133_v9 }
 0x224   :  { %175 = vpush %v85_v10 }
 0x225   :  { %177 = vpush %v91_v11 }
 0x254   :  { %s174_s2 = spop %173 }
 0x255   :  { %136 = sst [smem:[#allocation9]] %s174_s2  ;;  %s176_s21 = spop %175 }
 0x256   :  { %139 = sst [smem:[#allocation9 + $0x1]] %s176_s21  ;;  %s178_s22 = spop %177 }
 0x257   :  { %142 = sst [smem:[#allocation9 + $0x2]] %s178_s22 }
 0x258   :  { %266 = shalt.err (!%p263_p12)
}
 0x259   :  { %s280_s30 = smov [#allocation9]  }
 0x25a   :  { %160 = dma.smem_to_hbm %s280_s30, 16, %s352_s3, [#allocation5]  }
 0x25b   :  { %271 = dma.done.wait [#allocation4], 128  }
 0x25c   :  { %272 = vsyncadd [#allocation4], 4294967168 }
 0x25d   :  { %273 = dma.done.wait [#allocation5], 16  }
 0x25e   :  { %274 = vsyncadd [#allocation5], 4294967280 }
 0x25f   :  { %167 = sfence }
 0x260   :  { %168 = vsyncpa [#allocation3], 1 }
 0x261   :  { %169 = vsyncpa [#allocation7], 1 }
 0x262   :  { %170 = vsyncpa [#allocation4], 1 }
 0x263   :  { %171 = vsyncpa [#allocation5], 1 }

</bundles_post_ra>
